<compile_context>
chip_gen: v7x
topology: tpu7x:2x2x1
jax: 0.10.0
libtpu: 0.0.40
codegen_flags: <defaults>
</compile_context>

<pallas_src>
import functools

import numpy as np
import jax
import jax.numpy as jnp
from jax.experimental import pallas as pl
from jax.experimental.pallas import tpu as pltpu


def _round_up(x, m):
    return ((x + m - 1) // m) * m


# ---------------------------------------------------------------------------
# Kernel 1: fused embedding lookup + masked mean-pool + linear projection.
#   ids   : (tile_n, L)  int32   (masked positions already set to padding_idx)
#   table : (V, E)       bf16    (full block, VMEM resident)
#   W     : (E, D)       bf16    (full block, VMEM resident)
#   out   : (tile_n, D)  f32
#
# The gather is expressed as masked per-row token counts (tile_n, V) followed
# by one MXU matmul counts @ table -- identical math to gather + masked sum,
# and out-of-range ids simply contribute nothing (no OOB reads).
# ---------------------------------------------------------------------------
def pool_proj_kernel(ids_ref, table_ref, w_ref, out_ref, *, padding_idx):
    ids = ids_ref[...]                                     # (tn, L) int32
    tn, L = ids.shape
    V = table_ref.shape[0]

    v_iota = jax.lax.broadcasted_iota(jnp.int32, (tn, V), 1)
    counts = jnp.zeros((tn, V), jnp.float32)
    # L is small and static here (<= 24); unrolled VPU loop over positions.
    # TODO(synk): for real BERT seq lengths / vocab sizes, replace the one-hot
    # counts with a scalar-prefetch / DMA row gather and add an L grid axis
    # ("arbitrary") with a VMEM accumulator.
    for l in range(L):
        tok = ids[:, l:l + 1]                              # (tn, 1)
        hit = jnp.logical_and(v_iota == tok, tok != padding_idx)
        counts = counts + hit.astype(jnp.float32)

    denom = jnp.maximum(jnp.sum(counts, axis=1, keepdims=True), 1.0)   # (tn, 1)
    # counts are small integers -> exact in bf16; MXU matmul, f32 accumulation.
    summed = jnp.dot(counts.astype(jnp.bfloat16), table_ref[...],
                     preferred_element_type=jnp.float32)               # (tn, E)
    # divide -> EUP approx reciprocal (frees the VALU slot)
    pooled = summed * pl.reciprocal(denom, approx=True)                # (tn, E)
    out_ref[...] = jnp.dot(pooled.astype(jnp.bfloat16), w_ref[...],
                           preferred_element_type=jnp.float32)         # (tn, D)


def pooled_representation(ids, emb_table, w_proj, padding_idx, tile_n=256):
    """Synthetic inner_model.forward_representation: (N, L) ids -> (N, D)."""
    N, L = ids.shape
    V, E = emb_table.shape
    D = w_proj.shape[1]

    tile_n = min(tile_n, _round_up(max(N, 1), 8))      # big tiles at scale,
    Np = _round_up(N, tile_n)                          # minimal padding when tiny
    if Np != N:
        ids = jnp.pad(ids, ((0, Np - N), (0, 0)), constant_values=padding_idx)

    kernel = functools.partial(pool_proj_kernel, padding_idx=padding_idx)
    # TODO(synk): when emb_table is a real 30K-row table, keep it bf16 (done)
    # and raise vmem_limit_bytes via pltpu.CompilerParams for v7x headroom.
    out = pl.pallas_call(
        kernel,
        out_shape=jax.ShapeDtypeStruct((Np, D), jnp.float32),
        grid=(Np // tile_n,),
        in_specs=[
            pl.BlockSpec((tile_n, L), lambda i: (i, 0)),
            pl.BlockSpec((V, E), lambda i: (0, 0)),     # resident across grid
            pl.BlockSpec((E, D), lambda i: (0, 0)),     # resident across grid
        ],
        out_specs=pl.BlockSpec((tile_n, D), lambda i: (i, 0)),
        compiler_params=pltpu.CompilerParams(
            dimension_semantics=("parallel",)),
    )(ids, emb_table, w_proj)
    return out[:N]


# ---------------------------------------------------------------------------
# Kernel 2: packed-chunk masking + mean over passages + query.dot(doc) score.
#   passage_per_doc : (tile_b, P, D) f32  (unmasked chunk reps)
#   packed          : (tile_b, P)    f32  (1.0 for packed chunks, else 0.0)
#   query_vecs      : (tile_b, D)    f32
#   out             : (tile_b, 128)  f32  score broadcast across 128 lanes
#                     (lane-dense unmasked stores; wrapper reads column 0)
# ---------------------------------------------------------------------------
def mean_p_score_kernel(pvec_ref, packed_ref, qvec_ref, out_ref, *, inv_num_chunks):
    p = pvec_ref[...]                                   # (tb, P, D)
    m = packed_ref[...]                                 # (tb, P)
    q = qvec_ref[...]                                   # (tb, D)
    # zero non-packed chunks here (== PyTorch scatter into zeros), then mean
    # over ALL P chunks including the zeroed ones -- matches reference exactly.
    doc = jnp.sum(p * m[:, :, None], axis=1) * inv_num_chunks          # (tb, D)
    score = jnp.sum(doc * q, axis=-1, keepdims=True)                   # (tb, 1)
    out_ref[...] = jnp.broadcast_to(score, out_ref.shape)              # (tb, 128)


_SCORE_LANES = 128


def mean_passage_score(passage_per_doc, packed, query_vecs, tile_b=128):
    B, P, D = passage_per_doc.shape
    tile_b = min(tile_b, _round_up(max(B, 1), 8))
    Bp = _round_up(B, tile_b)
    if Bp != B:
        passage_per_doc = jnp.pad(passage_per_doc, ((0, Bp - B), (0, 0), (0, 0)))
        packed = jnp.pad(packed, ((0, Bp - B), (0, 0)))
        query_vecs = jnp.pad(query_vecs, ((0, Bp - B), (0, 0)))

    kernel = functools.partial(mean_p_score_kernel, inv_num_chunks=1.0 / P)
    out = pl.pallas_call(
        kernel,
        out_shape=jax.ShapeDtypeStruct((Bp, _SCORE_LANES), jnp.float32),
        grid=(Bp // tile_b,),
        in_specs=[
            pl.BlockSpec((tile_b, P, D), lambda i: (i, 0, 0)),
            pl.BlockSpec((tile_b, P), lambda i: (i, 0)),
            pl.BlockSpec((tile_b, D), lambda i: (i, 0)),
        ],
        out_specs=pl.BlockSpec((tile_b, _SCORE_LANES), lambda i: (i, 0)),
        compiler_params=pltpu.CompilerParams(
            dimension_semantics=("parallel",)),
    )(passage_per_doc, packed, query_vecs)
    return out[:B, 0]


# ---------------------------------------------------------------------------
# MeanPAdapter forward (chunking glue + two Pallas kernels).
# ---------------------------------------------------------------------------
class MeanPAdapterPallas:
    def __init__(self, emb_table, w_proj, chunk_size=16, overlap=4, padding_idx=0):
        # inner-model weights stored in bf16 (halves DMA / VMEM footprint);
        # matmuls accumulate in f32 inside the kernels.
        self.emb_table = emb_table.astype(jnp.bfloat16)
        self.w_proj = w_proj.astype(jnp.bfloat16)
        self.chunk_size = chunk_size
        self.overlap = overlap
        self.extended_chunk_size = chunk_size + 2 * overlap
        self.padding_idx = padding_idx

    def __call__(self, query_ids, query_mask, doc_ids):
        # --- document chunking (static-shape glue, mirrors the PyTorch code) ---
        document_ids = doc_ids[:, 1:]
        doc_len = document_ids.shape[1]
        if doc_len > self.overlap:
            needed_padding = self.extended_chunk_size - (doc_len % self.chunk_size - self.overlap)
        else:
            needed_padding = self.extended_chunk_size - self.overlap - doc_len
        document_ids = jnp.pad(
            document_ids, ((0, 0), (self.overlap, needed_padding)),
            constant_values=self.padding_idx)

        padded_len = document_ids.shape[1]
        num_windows = (padded_len - self.extended_chunk_size) // self.chunk_size + 1
        win_idx = (np.arange(num_windows)[:, None] * self.chunk_size
                   + np.arange(self.extended_chunk_size)[None, :])
        chunked_ids = document_ids[:, win_idx]                       # (B, P, ext)

        batch_size, chunk_pieces = chunked_ids.shape[0], chunked_ids.shape[1]
        chunked_ids_unrolled = chunked_ids.reshape(-1, self.extended_chunk_size)
        packed_indices = jnp.any(
            chunked_ids_unrolled[:, self.overlap:-self.overlap] != self.padding_idx,
            axis=-1)                                                 # (B*P,)

        # --- inner model representations (Pallas kernel #1, gather fused) ---
        # query attention mask applied by replacing masked ids with padding_idx
        query_ids_masked = jnp.where(query_mask != 0, query_ids,
                                     self.padding_idx).astype(jnp.int32)
        query_vecs = pooled_representation(
            query_ids_masked, self.emb_table, self.w_proj, self.padding_idx)      # (B, D)
        passage_reps = pooled_representation(
            chunked_ids_unrolled, self.emb_table, self.w_proj, self.padding_idx)  # (B*P, D)

        passage_per_doc = passage_reps.reshape(batch_size, chunk_pieces, -1)
        packed_f = packed_indices.reshape(batch_size, chunk_pieces).astype(jnp.float32)

        # --- packed masking + mean over passages + query·doc score (kernel #2) ---
        return mean_passage_score(passage_per_doc, packed_f, query_vecs)          # (B,)


if __name__ == "__main__":
    key = jax.random.PRNGKey(0)
    k_emb, k_w, k_doc, k_q = jax.random.split(key, 4)

    B = 2
    VOCAB = 64
    E = 128          # embedding dim
    D = 128          # pooled representation dim
    Q_LEN = 8
    DOC_LEN = 41     # -> 40 after dropping the first token
    CHUNK = 16
    OVERLAP = 4
    PAD_IDX = 0

    emb_table = jax.random.normal(k_emb, (VOCAB, E), jnp.float32) * 0.5
    w_proj = jax.random.normal(k_w, (E, D), jnp.float32) * (1.0 / np.sqrt(E))

    doc_ids = jax.random.randint(k_doc, (B, DOC_LEN), 1, VOCAB, dtype=jnp.int32)
    # give document 1 a padded tail so some chunks become non-packed
    doc_ids = doc_ids.at[1, 20:].set(PAD_IDX)

    query_ids = jax.random.randint(k_q, (B, Q_LEN), 1, VOCAB, dtype=jnp.int32)
    query_mask = jnp.ones((B, Q_LEN), jnp.int32).at[1, 6:].set(0)

    adapter = MeanPAdapterPallas(emb_table, w_proj, chunk_size=CHUNK,
                                 overlap=OVERLAP, padding_idx=PAD_IDX)
    score = jax.block_until_ready(adapter(query_ids, query_mask, doc_ids))

    # ---- pure-JAX f32 reference (same math, no Pallas; bf16 weight values) ----
    table_f32 = adapter.emb_table.astype(jnp.float32)
    w_f32 = adapter.w_proj.astype(jnp.float32)

    def ref_pool(ids):
        e = jnp.take(table_f32, ids, axis=0)
        m = (ids != PAD_IDX).astype(jnp.float32)
        s = jnp.sum(e * m[:, :, None], axis=1)
        return (s / jnp.maximum(m.sum(1, keepdims=True), 1.0)) @ w_f32

    d = doc_ids[:, 1:]
    ext = CHUNK + 2 * OVERLAP
    need = ext - (d.shape[1] % CHUNK - OVERLAP)
    d = jnp.pad(d, ((0, 0), (OVERLAP, need)), constant_values=PAD_IDX)
    nwin = (d.shape[1] - ext) // CHUNK + 1
    widx = np.arange(nwin)[:, None] * CHUNK + np.arange(ext)[None, :]
    ch = d[:, widx].reshape(-1, ext)
    pk = jnp.any(ch[:, OVERLAP:-OVERLAP] != PAD_IDX, axis=-1)
    preps = ref_pool(ch) * pk[:, None]
    dvec = preps.reshape(B, nwin, -1).mean(1)
    qvec = ref_pool(jnp.where(query_mask != 0, query_ids, PAD_IDX))
    ref_score = jnp.sum(qvec * dvec, axis=-1)

    assert score.shape == (B,)
    # tolerance absorbs bf16 matmul operands + EUP approx reciprocal vs f32 ref
    assert np.allclose(np.asarray(score), np.asarray(ref_score),
                       rtol=2e-2, atol=5e-3), (np.asarray(score), np.asarray(ref_score))
    print("KERNEL_OK")
</pallas_src>

<mosaic_0001>
module attributes {stable_mosaic.version = 11 : i64} {
  func.func @pool_proj_kernel(%arg0: i32, %arg1: memref<8x8xi32, #tpu.memory_space<vmem>>, %arg2: memref<64x128xbf16, #tpu.memory_space<vmem>>, %arg3: memref<128x128xbf16, #tpu.memory_space<vmem>>, %arg4: memref<8x128xf32, #tpu.memory_space<vmem>>) attributes {dimension_semantics = [#tpu.dimension_semantics<parallel>], iteration_bounds = array<i64: 1>, scalar_prefetch = 0 : i64, scratch_operands = 0 : i64, tpu.core_type = #tpu.core_type<tc>, window_params = [{transform_indices = @transform_0, window_bounds = array<i64: 8, 8>}, {pipeline_mode = #tpu.pipeline_mode<synchronous>, transform_indices = @transform_1, window_bounds = array<i64: 64, 128>}, {pipeline_mode = #tpu.pipeline_mode<synchronous>, transform_indices = @transform_2, window_bounds = array<i64: 128, 128>}, {transform_indices = @transform_3, window_bounds = array<i64: 8, 128>}]} {
    %c0 = arith.constant 0 : index
    %c0_0 = arith.constant 0 : index
    %0 = vector.load %arg1[%c0, %c0_0] : memref<8x8xi32, #tpu.memory_space<vmem>>, vector<8x8xi32>
    %1 = tpu.iota {dimensions = array<i32: 1>} : vector<8x64xi32>
    %cst = arith.constant 0.000000e+00 : f32
    %2 = vector.broadcast %cst : f32 to vector<8x64xf32>
    %3 = vector.extract_strided_slice %0 {offsets = [0, 0], sizes = [8, 1], strides = [1, 1]} : vector<8x8xi32> to vector<8x1xi32>
    %4 = vector.broadcast %3 : vector<8x1xi32> to vector<8x64xi32>
    %5 = arith.cmpi eq, %1, %4 : vector<8x64xi32>
    %c0_i32 = arith.constant 0 : i32
    %6 = vector.broadcast %c0_i32 : i32 to vector<8x1xi32>
    %7 = arith.cmpi ne, %3, %6 : vector<8x1xi32>
    %8 = vector.broadcast %7 : vector<8x1xi1> to vector<8x64xi1>
    %9 = arith.andi %5, %8 : vector<8x64xi1>
    %10 = arith.extui %9 : vector<8x64xi1> to vector<8x64xi32>
    %11 = arith.sitofp %10 : vector<8x64xi32> to vector<8x64xf32>
    %12 = arith.addf %2, %11 : vector<8x64xf32>
    %13 = vector.extract_strided_slice %0 {offsets = [0, 1], sizes = [8, 1], strides = [1, 1]} : vector<8x8xi32> to vector<8x1xi32>
    %14 = vector.broadcast %13 : vector<8x1xi32> to vector<8x64xi32>
    %15 = arith.cmpi eq, %1, %14 : vector<8x64xi32>
    %c0_i32_1 = arith.constant 0 : i32
    %16 = vector.broadcast %c0_i32_1 : i32 to vector<8x1xi32>
    %17 = arith.cmpi ne, %13, %16 : vector<8x1xi32>
    %18 = vector.broadcast %17 : vector<8x1xi1> to vector<8x64xi1>
    %19 = arith.andi %15, %18 : vector<8x64xi1>
    %20 = arith.extui %19 : vector<8x64xi1> to vector<8x64xi32>
    %21 = arith.sitofp %20 : vector<8x64xi32> to vector<8x64xf32>
    %22 = arith.addf %12, %21 : vector<8x64xf32>
    %23 = vector.extract_strided_slice %0 {offsets = [0, 2], sizes = [8, 1], strides = [1, 1]} : vector<8x8xi32> to vector<8x1xi32>
    %24 = vector.broadcast %23 : vector<8x1xi32> to vector<8x64xi32>
    %25 = arith.cmpi eq, %1, %24 : vector<8x64xi32>
    %c0_i32_2 = arith.constant 0 : i32
    %26 = vector.broadcast %c0_i32_2 : i32 to vector<8x1xi32>
    %27 = arith.cmpi ne, %23, %26 : vector<8x1xi32>
    %28 = vector.broadcast %27 : vector<8x1xi1> to vector<8x64xi1>
    %29 = arith.andi %25, %28 : vector<8x64xi1>
    %30 = arith.extui %29 : vector<8x64xi1> to vector<8x64xi32>
    %31 = arith.sitofp %30 : vector<8x64xi32> to vector<8x64xf32>
    %32 = arith.addf %22, %31 : vector<8x64xf32>
    %33 = vector.extract_strided_slice %0 {offsets = [0, 3], sizes = [8, 1], strides = [1, 1]} : vector<8x8xi32> to vector<8x1xi32>
    %34 = vector.broadcast %33 : vector<8x1xi32> to vector<8x64xi32>
    %35 = arith.cmpi eq, %1, %34 : vector<8x64xi32>
    %c0_i32_3 = arith.constant 0 : i32
    %36 = vector.broadcast %c0_i32_3 : i32 to vector<8x1xi32>
    %37 = arith.cmpi ne, %33, %36 : vector<8x1xi32>
    %38 = vector.broadcast %37 : vector<8x1xi1> to vector<8x64xi1>
    %39 = arith.andi %35, %38 : vector<8x64xi1>
    %40 = arith.extui %39 : vector<8x64xi1> to vector<8x64xi32>
    %41 = arith.sitofp %40 : vector<8x64xi32> to vector<8x64xf32>
    %42 = arith.addf %32, %41 : vector<8x64xf32>
    %43 = vector.extract_strided_slice %0 {offsets = [0, 4], sizes = [8, 1], strides = [1, 1]} : vector<8x8xi32> to vector<8x1xi32>
    %44 = vector.broadcast %43 : vector<8x1xi32> to vector<8x64xi32>
    %45 = arith.cmpi eq, %1, %44 : vector<8x64xi32>
    %c0_i32_4 = arith.constant 0 : i32
    %46 = vector.broadcast %c0_i32_4 : i32 to vector<8x1xi32>
    %47 = arith.cmpi ne, %43, %46 : vector<8x1xi32>
    %48 = vector.broadcast %47 : vector<8x1xi1> to vector<8x64xi1>
    %49 = arith.andi %45, %48 : vector<8x64xi1>
    %50 = arith.extui %49 : vector<8x64xi1> to vector<8x64xi32>
    %51 = arith.sitofp %50 : vector<8x64xi32> to vector<8x64xf32>
    %52 = arith.addf %42, %51 : vector<8x64xf32>
    %53 = vector.extract_strided_slice %0 {offsets = [0, 5], sizes = [8, 1], strides = [1, 1]} : vector<8x8xi32> to vector<8x1xi32>
    %54 = vector.broadcast %53 : vector<8x1xi32> to vector<8x64xi32>
    %55 = arith.cmpi eq, %1, %54 : vector<8x64xi32>
    %c0_i32_5 = arith.constant 0 : i32
    %56 = vector.broadcast %c0_i32_5 : i32 to vector<8x1xi32>
    %57 = arith.cmpi ne, %53, %56 : vector<8x1xi32>
    %58 = vector.broadcast %57 : vector<8x1xi1> to vector<8x64xi1>
    %59 = arith.andi %55, %58 : vector<8x64xi1>
    %60 = arith.extui %59 : vector<8x64xi1> to vector<8x64xi32>
    %61 = arith.sitofp %60 : vector<8x64xi32> to vector<8x64xf32>
    %62 = arith.addf %52, %61 : vector<8x64xf32>
    %63 = vector.extract_strided_slice %0 {offsets = [0, 6], sizes = [8, 1], strides = [1, 1]} : vector<8x8xi32> to vector<8x1xi32>
    %64 = vector.broadcast %63 : vector<8x1xi32> to vector<8x64xi32>
    %65 = arith.cmpi eq, %1, %64 : vector<8x64xi32>
    %c0_i32_6 = arith.constant 0 : i32
    %66 = vector.broadcast %c0_i32_6 : i32 to vector<8x1xi32>
    %67 = arith.cmpi ne, %63, %66 : vector<8x1xi32>
    %68 = vector.broadcast %67 : vector<8x1xi1> to vector<8x64xi1>
    %69 = arith.andi %65, %68 : vector<8x64xi1>
    %70 = arith.extui %69 : vector<8x64xi1> to vector<8x64xi32>
    %71 = arith.sitofp %70 : vector<8x64xi32> to vector<8x64xf32>
    %72 = arith.addf %62, %71 : vector<8x64xf32>
    %73 = vector.extract_strided_slice %0 {offsets = [0, 7], sizes = [8, 1], strides = [1, 1]} : vector<8x8xi32> to vector<8x1xi32>
    %74 = vector.broadcast %73 : vector<8x1xi32> to vector<8x64xi32>
    %75 = arith.cmpi eq, %1, %74 : vector<8x64xi32>
    %c0_i32_7 = arith.constant 0 : i32
    %76 = vector.broadcast %c0_i32_7 : i32 to vector<8x1xi32>
    %77 = arith.cmpi ne, %73, %76 : vector<8x1xi32>
    %78 = vector.broadcast %77 : vector<8x1xi1> to vector<8x64xi1>
    %79 = arith.andi %75, %78 : vector<8x64xi1>
    %80 = arith.extui %79 : vector<8x64xi1> to vector<8x64xi32>
    %81 = arith.sitofp %80 : vector<8x64xi32> to vector<8x64xf32>
    %82 = arith.addf %72, %81 : vector<8x64xf32>
    %cst_8 = arith.constant dense<0.000000e+00> : vector<8xf32>
    %83 = vector.multi_reduction <add>, %82, %cst_8 [1] : vector<8x64xf32> to vector<8xf32>
    %84 = vector.shape_cast %83 : vector<8xf32> to vector<8x1xf32>
    %cst_9 = arith.constant 1.000000e+00 : f32
    %85 = vector.broadcast %cst_9 : f32 to vector<8x1xf32>
    %86 = arith.maximumf %84, %85 : vector<8x1xf32>
    %87 = arith.truncf %82 : vector<8x64xf32> to vector<8x64xbf16>
    %c0_10 = arith.constant 0 : index
    %c0_11 = arith.constant 0 : index
    %88 = vector.load %arg2[%c0_10, %c0_11] : memref<64x128xbf16, #tpu.memory_space<vmem>>, vector<64x128xbf16>
    %cst_12 = arith.constant dense<0.000000e+00> : vector<8x128xf32>
    %89 = tpu.matmul %87, %88, %cst_12 {dimension_numbers = #tpu.dot_dimension_numbers<[1], [0], [0], [1], [0, 0, 1, 1], [], []>} : vector<8x64xbf16>, vector<64x128xbf16>, vector<8x128xf32> -> vector<8x128xf32>
    %90 = tpu.reciprocal %86 {approx = true} : vector<8x1xf32> -> vector<8x1xf32>
    %91 = vector.broadcast %90 : vector<8x1xf32> to vector<8x128xf32>
    %92 = arith.mulf %89, %91 : vector<8x128xf32>
    %93 = arith.truncf %92 : vector<8x128xf32> to vector<8x128xbf16>
    %c0_13 = arith.constant 0 : index
    %c0_14 = arith.constant 0 : index
    %94 = vector.load %arg3[%c0_13, %c0_14] : memref<128x128xbf16, #tpu.memory_space<vmem>>, vector<128x128xbf16>
    %cst_15 = arith.constant dense<0.000000e+00> : vector<8x128xf32>
    %95 = tpu.matmul %93, %94, %cst_15 {dimension_numbers = #tpu.dot_dimension_numbers<[1], [0], [0], [1], [0, 0, 1, 1], [], []>} : vector<8x128xbf16>, vector<128x128xbf16>, vector<8x128xf32> -> vector<8x128xf32>
    %c0_16 = arith.constant 0 : index
    %c0_17 = arith.constant 0 : index
    %96 = vector.load %arg4[%c0_16, %c0_17] : memref<8x128xf32, #tpu.memory_space<vmem>>, vector<8x128xf32>
    tpu.vector_store %arg4[%c0_16, %c0_17], %95 {strides = array<i32>} : memref<8x128xf32, #tpu.memory_space<vmem>>, vector<8x128xf32>,
    return
  }
  func.func @transform_0(%arg0: i32) -> (i32, i32) {
    %c0_i32 = arith.constant 0 : i32
    %c0_i32_0 = arith.constant 0 : i32
    return %arg0, %c0_i32 : i32, i32
  }
  func.func @transform_1(%arg0: i32) -> (i32, i32) {
    %c0_i32 = arith.constant 0 : i32
    %c0_i32_0 = arith.constant 0 : i32
    %c0_i32_1 = arith.constant 0 : i32
    return %c0_i32, %c0_i32_0 : i32, i32
  }
  func.func @transform_2(%arg0: i32) -> (i32, i32) {
    %c0_i32 = arith.constant 0 : i32
    %c0_i32_0 = arith.constant 0 : i32
    %c0_i32_1 = arith.constant 0 : i32
    return %c0_i32, %c0_i32_0 : i32, i32
  }
  func.func @transform_3(%arg0: i32) -> (i32, i32) {
    %c0_i32 = arith.constant 0 : i32
    %c0_i32_0 = arith.constant 0 : i32
    return %arg0, %c0_i32 : i32, i32
  }
}

</mosaic_0001>

<bundles_post_ra>
// kernel: tpu_custom_call.1
= control target key start
LH: loop header
LB: loop body
LE: loop exit
PB: predicated region body
PF: predicated region fallthrough
CT: control target
= control target key end

     0   :  { %8 = vsyncpa [#allocation3], 0  ;;  %s677_s0 = inlined_call_operand.hbm [shape: s32[8,8], index: 0, kind: input, shape index: {}]   ;;  %s678_s1 = inlined_call_operand.hbm [shape: bf16[64,128], index: 1, kind: input, shape index: {}]   ;;  %s679_s2 = inlined_call_operand.hbm [shape: bf16[128,128], index: 2, kind: input, shape index: {}]   ;;  %s680_s3 = inlined_call_operand.hbm [shape: f32[8,128], index: 3, kind: output, shape index: {}]  }
   0x1   :  { %9 = vsyncpa [#allocation6], 0 }
   0x2   :  { %10 = vsyncpa [#allocation4], 0  ;;  %s565_s12 = smov [#allocation5]   ;;  %s471_s16 = scalar_lea.hbm %s678_s1, 512 }
   0x3   :  { %s26_s13 = sshll.u32 %s565_s12, 4  ;;  %p472_p0 = scmp.ne.s32.totalorder %s678_s1, %s471_s16  ;;  %s27_s13 = int_to_ptr.vmem [resolvable:$true] %s26_s13 }
   0x4   :  { %p475_p1 = scmp.lt.u32.totalorder %s471_s16, %s678_s1 }
   0x6   :  { %p477_p2 = pnand %p475_p1, %p472_p0 }
   0x8   :  { %480 = shalt.err (!%p477_p2)
}
   0x9   :  { %s481_s21 = scalar_lea.vmem %s27_s13, 512  ;;  %p486_p4 = scmp.lt.s32.totalorder %s27_s13, %s27_s13 }
   0xa   :  { %p482_p3 = scmp.ne.s32.totalorder %s27_s13, %s481_s21  ;;  %p487_p5 = scmp.lt.s32.totalorder %s481_s21, %s481_s21 }
   0xc   :  { %p488_p6 = por %p487_p5, %p486_p4 }
   0xe   :  { %p489_p7 = pnand %p488_p6, %p482_p3 }
  0x10   :  { %492 = shalt.err (!%p489_p7)
}
  0x11   :  { %s566_s22 = smov 64   ;;  %s567_s23 = smov 4  }
  0x12   :  { %32 = dma.hbm_to_vmem [thread:$0]  %s678_s1, 512, %s27_s13, [#allocation6], %s566_s22, %s566_s22, %s567_s23  }
  0x13   :  { %s568_s26 = smov [#allocation2]   ;;  %s569_s28 = smov [#allocation7]  }
  0x14   :  { %s17_s27 = sshll.u32 %s568_s26, 4  ;;  %s38_s29 = sshll.u32 %s569_s28, 4  ;;  %s18_s27 = int_to_ptr.vmem [resolvable:$true] %s17_s27  ;;  %s39_s29 = int_to_ptr.vmem [resolvable:$true] %s38_s29 }
  0x15   :  { %s493_s5 = scalar_lea.hbm %s677_s0, 128 }
  0x16   :  { %p494_p8 = scmp.ne.s32.totalorder %s677_s0, %s493_s5  ;;  %p497_p9 = scmp.lt.u32.totalorder %s493_s5, %s677_s0 }
  0x18   :  { %p499_p10 = pnand %p497_p9, %p494_p8 }
  0x1a   :  { %502 = shalt.err (!%p499_p10)
}
  0x1b   :  { %s503_s1 = scalar_lea.vmem %s18_s27, 128  ;;  %p508_p12 = scmp.lt.s32.totalorder %s18_s27, %s18_s27 }
  0x1c   :  { %p504_p11 = scmp.ne.s32.totalorder %s18_s27, %s503_s1  ;;  %p509_p13 = scmp.lt.s32.totalorder %s503_s1, %s503_s1 }
  0x1e   :  { %p510_p0 = por %p509_p13, %p508_p12 }
  0x20   :  { %p511_p1 = pnand %p510_p0, %p504_p11 }
  0x22   :  { %514 = shalt.err (!%p511_p1)
}
  0x23   :  { %20 = dma.hbm_to_vmem [thread:$0]  %s677_s0, 128, %s18_s27, [#allocation3]  }
  0x24   :  { %s515_s14 = scalar_lea.hbm %s679_s2, 1024 }
  0x25   :  { %p516_p2 = scmp.ne.s32.totalorder %s679_s2, %s515_s14  ;;  %p519_p3 = scmp.lt.u32.totalorder %s515_s14, %s679_s2 }
  0x27   :  { %p521_p4 = pnand %p519_p3, %p516_p2 }
  0x29   :  { %524 = shalt.err (!%p521_p4)
}
  0x2a   :  { %s525_s19 = scalar_lea.vmem %s39_s29, 1024  ;;  %p530_p6 = scmp.lt.s32.totalorder %s39_s29, %s39_s29 }
  0x2b   :  { %p526_p5 = scmp.ne.s32.totalorder %s39_s29, %s525_s19  ;;  %p531_p7 = scmp.lt.s32.totalorder %s525_s19, %s525_s19 }
  0x2d   :  { %p532_p8 = por %p531_p7, %p530_p6 }
  0x2f   :  { %p533_p9 = pnand %p532_p8, %p526_p5 }
  0x31   :  { %536 = shalt.err (!%p533_p9)
}
  0x32   :  { %44 = dma.hbm_to_vmem [thread:$0]  %s679_s2, 1024, %s39_s29, [#allocation6], %s566_s22, %s566_s22, %s567_s23  }
  0x33   :  { %559 = dma.done.wait [#allocation3], 128  }
  0x34   :  { %560 = vsyncadd [#allocation3], 4294967168 }
  0x35   :  { %561 = dma.done.wait [#allocation6], 1536  }
  0x36   :  { %562 = vsyncadd [#allocation6], 4294965760  ;;  %v570_v0 = vmov 1   ;;  %v571_v1 = vmov 0   ;;  %v55_v2 = vld [vmem:[#allocation2] sm:$0xff]  ;;  %v572_v4 = vmov 0.0   ;;  %v56_v22 = vlaneseq }
  0x37   :  { %445 = vset.pattern.permute.xlu1 %v570_v0  ;;  %444 = vset.pattern.permute.xlu0 %v571_v1  ;;  %vm62_vm0 = vcmp.ne.s32.totalorder %v55_v2, 0  ;;  %v573_v5 = vmov 2   ;;  %v574_v6 = vmov 3   ;;  %v575_v7 = vmov 4   ;;  %v457_v11 = vld [vmem:[#allocation5] sm:$0xff]   ;;  %v458_v12 = vld [vmem:[#allocation5 + $0x8] sm:$0xff]  }
  0x38   :  { %73 = vperm.xlu1 %445, %v55_v2   ;;  %59 = vperm.xlu0 %444, %v55_v2   ;;  %v63_v3 = vsel %vm62_vm0, 1, %v571_v1  ;;  %v576_v8 = vmov 5   ;;  %v577_v9 = vmov 6   ;;  %v578_v10 = vmov 7   ;;  %v459_v13 = vld [vmem:[#allocation5 + $0x10] sm:$0xff]   ;;  %v460_v14 = vld [vmem:[#allocation5 + $0x18] sm:$0xff]  }
  0x39   :  { %396 = vmatprep.subr.bf16.mxu0 %v572_v4  ;;  %408 = vmatprep.subr.bf16.mxu1 %v572_v4  ;;  %vm579_vm1 = vmmov 0   ;;  %v57_v24 = vand.u32 127, %v56_v22  ;;  %v461_v50 = vld [vmem:[#allocation7] sm:$0xff]   ;;  %v462_v51 = vld [vmem:[#allocation7 + $0x8] sm:$0xff]   ;;  %v463_v52 = vld [vmem:[#allocation7 + $0x10] sm:$0xff]   ;;  %s580_s2 = smov [#allocation8]  }
  0x3a   :  { %397 = vmatpush3.bf16.msra.mxu0 %v457_v11  ;;  %404 = vmatprep.mubr.msk.bf16.mxu0 %vm579_vm1, %v572_v4  ;;  %v464_v53 = vld [vmem:[#allocation7 + $0x18] sm:$0xff]   ;;  %v465_v54 = vld [vmem:[#allocation7 + $0x20] sm:$0xff]   ;;  %v466_v55 = vld [vmem:[#allocation7 + $0x28] sm:$0xff]   ;;  %s351_s21 = sshll.u32 %s580_s2, 4  ;;  %s352_s21 = int_to_ptr.vmem [resolvable:$true] %s351_s21 }
  0x3b   :  { %398 = vmatprep.subr.bf16.mxu0 %v572_v4  ;;  %424 = vmatprep.mubr.msk.bf16.mxu1 %vm579_vm1, %v572_v4  ;;  %v467_v56 = vld [vmem:[#allocation7 + $0x30] sm:$0xff]   ;;  %v468_v57 = vld [vmem:[#allocation7 + $0x38] sm:$0xff]   ;;  %s537_s22 = scalar_lea.vmem %s352_s21, 128  ;;  %p542_p11 = scmp.lt.s32.totalorder %s352_s21, %s352_s21 }
  0x3c   :  { %77 = vperm.xlu1 %445, %v63_v3   ;;  %65 = vperm.xlu0 %444, %v63_v3   ;;  %p538_p10 = scmp.ne.s32.totalorder %s352_s21, %s537_s22  ;;  %p543_p12 = scmp.lt.s32.totalorder %s537_s22, %s537_s22 }
  0x3d   :  { %409 = vmatpush3.bf16.msra.mxu1 %v461_v50 }
  0x3e   :  { %399 = vmatpush3.bf16.msra.mxu0 %v458_v12  ;;  %410 = vmatprep.subr.bf16.mxu1 %v572_v4  ;;  %p544_p13 = por %p543_p12, %p542_p11 }
  0x3f   :  { %400 = vmatprep.subr.bf16.mxu0 %v572_v4 }
  0x40   :  { %447 = vset.pattern.permute.xlu1 %v573_v5  ;;  %446 = vset.pattern.permute.xlu0 %v573_v5  ;;  %p545_p0 = pnand %p544_p13, %p538_p10 }
  0x41   :  { %89 = vperm.xlu1 %447, %v63_v3   ;;  %85 = vperm.xlu0 %446, %v55_v2  }
  0x42   :  { %401 = vmatpush3.bf16.msra.mxu0 %v459_v13  ;;  %411 = vmatpush3.bf16.msra.mxu1 %v462_v51 }
  0x43   :  { %402 = vmatprep.subr.bf16.mxu0 %v572_v4  ;;  %412 = vmatprep.subr.bf16.mxu1 %v572_v4 }
  0x45   :  { %448 = vset.pattern.permute.xlu1 %v574_v6  ;;  %449 = vset.pattern.permute.xlu0 %v574_v6 }
  0x46   :  { %97 = vperm.xlu1 %448, %v55_v2   ;;  %101 = vperm.xlu0 %449, %v63_v3  }
  0x47   :  { %403 = vmatpush3.bf16.msra.mxu0 %v460_v14  ;;  %413 = vmatpush3.bf16.msra.mxu1 %v463_v52 }
  0x48   :  { %414 = vmatprep.subr.bf16.mxu1 %v572_v4 }
  0x4a   :  { %450 = vset.pattern.permute.xlu1 %v575_v7  ;;  %451 = vset.pattern.permute.xlu0 %v576_v8 }
  0x4b   :  { %109 = vperm.xlu1 %450, %v55_v2   ;;  %121 = vperm.xlu0 %451, %v55_v2  }
  0x4c   :  { %415 = vmatpush3.bf16.msra.mxu1 %v464_v53 }
  0x4d   :  { %416 = vmatprep.subr.bf16.mxu1 %v572_v4 }
  0x4f   :  { %113 = vperm.xlu1 %450, %v63_v3   ;;  %454 = vset.pattern.permute.xlu0 %v577_v9 }
  0x50   :  { %137 = vperm.xlu0 %454, %v63_v3   ;;  %417 = vmatpush3.bf16.msra.mxu1 %v465_v54 }
  0x51   :  { %418 = vmatprep.subr.bf16.mxu1 %v572_v4 }
  0x53   :  { %452 = vset.pattern.permute.xlu1 %v576_v8 }
  0x54   :  { %125 = vperm.xlu1 %452, %v63_v3   ;;  %456 = vset.pattern.permute.xlu0 %v578_v10 }
  0x55   :  { %419 = vmatpush3.bf16.msra.mxu1 %v466_v55 }
  0x56   :  { %420 = vmatprep.subr.bf16.mxu1 %v572_v4 }
  0x58   :  { %453 = vset.pattern.permute.xlu1 %v577_v9 }
  0x59   :  { %133 = vperm.xlu1 %453, %v55_v2   ;;  %421 = vmatpush3.bf16.msra.mxu1 %v467_v56 }
  0x5a   :  { %422 = vmatprep.subr.bf16.mxu1 %v572_v4 }
  0x5d   :  { %455 = vset.pattern.permute.xlu1 %v578_v10  ;;  %423 = vmatpush3.bf16.msra.mxu1 %v468_v57 }
  0x5e   :  { %145 = vperm.xlu1 %455, %v55_v2  }
  0x62   :  { %149 = vperm.xlu1 %455, %v63_v3  }
  0xb7   :  { %v74_v15 = vpop.permute.xlu1 %73  ;;  %v60_v16 = vpop.permute.xlu0 %59 }
  0xb8   :  { %vm61_vm3 = vcmp.eq.s32.totalorder %v57_v24, %v60_v16  ;;  %vm75_vm5 = vcmp.eq.s32.totalorder %v57_v24, %v74_v15 }
  0xbb   :  { %v78_v17 = vpop.permute.xlu1 %77  ;;  %v66_v19 = vpop.permute.xlu0 %65 }
  0xbc   :  { %vm79_vm2 = vcmp.eq.s32.totalorder %v78_v17, 1  ;;  %vm67_vm4 = vcmp.eq.s32.totalorder %v66_v19, 1 }
  0xbd   :  { %vm80_vm6 = vmand %vm75_vm5, %vm79_vm2 }
  0xbe   :  { %vm68_vm9 = vmand %vm61_vm3, %vm67_vm4  ;;  %v362_v29 = vsel %vm80_vm6, 1.0, %v572_v4 }
  0xbf   :  { %v361_v30 = vsel %vm68_vm9, 1.0, %v572_v4 }
  0xc0   :  { %v90_v18 = vpop.permute.xlu1 %89  ;;  %v86_v21 = vpop.permute.xlu0 %85  ;;  %v83_v34 = vadd.f32 %v362_v29, %v361_v30 }
  0xc1   :  { %vm91_vm7 = vcmp.eq.s32.totalorder %v90_v18, 1  ;;  %vm87_vm8 = vcmp.eq.s32.totalorder %v57_v24, %v86_v21 }
  0xc2   :  { %vm92_vm12 = vmand %vm87_vm8, %vm91_vm7 }
  0xc3   :  { %v363_v32 = vsel %vm92_vm12, 1.0, %v572_v4 }
  0xc4   :  { %v95_v36 = vadd.f32 %v363_v32, %v83_v34 }
  0xc5   :  { %v98_v20 = vpop.permute.xlu1 %97  ;;  %v102_v25 = vpop.permute.xlu0 %101 }
  0xc6   :  { %vm99_vm10 = vcmp.eq.s32.totalorder %v57_v24, %v98_v20  ;;  %vm103_vm11 = vcmp.eq.s32.totalorder %v102_v25, 1 }
  0xc7   :  { %vm104_vm14 = vmand %vm99_vm10, %vm103_vm11  ;;  %vm156_vm10 = vcmask 523264  }
  0xc8   :  { %v364_v35 = vsel %vm104_vm14, 1.0, %v572_v4 }
  0xc9   :  { %v107_v38 = vadd.f32 %v364_v35, %v95_v36 }
  0xca   :  { %v110_v23 = vpop.permute.xlu1 %109  ;;  %v122_v27 = vpop.permute.xlu0 %121 }
  0xcb   :  { %vm111_vm15 = vcmp.eq.s32.totalorder %v57_v24, %v110_v23  ;;  %vm123_vm1 = vcmp.eq.s32.totalorder %v57_v24, %v122_v27 }
  0xce   :  { %v114_v26 = vpop.permute.xlu1 %113 }
  0xcf   :  { %vm115_vm13 = vcmp.eq.s32.totalorder %v114_v26, 1  ;;  %v138_v31 = vpop.permute.xlu0 %137 }
  0xd0   :  { %vm116_vm2 = vmand %vm111_vm15, %vm115_vm13  ;;  %vm139_vm4 = vcmp.eq.s32.totalorder %v138_v31, 1 }
  0xd1   :  { %v365_v37 = vsel %vm116_vm2, 1.0, %v572_v4 }
  0xd2   :  { %v119_v41 = vadd.f32 %v365_v37, %v107_v38 }
  0xd3   :  { %v126_v28 = vpop.permute.xlu1 %125 }
  0xd4   :  { %vm127_vm0 = vcmp.eq.s32.totalorder %v126_v28, 1 }
  0xd5   :  { %vm128_vm5 = vmand %vm123_vm1, %vm127_vm0 }
  0xd6   :  { %v366_v40 = vsel %vm128_vm5, 1.0, %v572_v4 }
  0xd7   :  { %v131_v43 = vadd.f32 %v366_v40, %v119_v41 }
  0xd8   :  { %v134_v33 = vpop.permute.xlu1 %133 }
  0xd9   :  { %vm135_vm3 = vcmp.eq.s32.totalorder %v57_v24, %v134_v33 }
  0xda   :  { %vm140_vm6 = vmand %vm135_vm3, %vm139_vm4 }
  0xdb   :  { %v367_v42 = vsel %vm140_vm6, 1.0, %v572_v4 }
  0xdc   :  { %v143_v45 = vadd.f32 %v367_v42, %v131_v43 }
  0xdd   :  { %v146_v39 = vpop.permute.xlu1 %145 }
  0xde   :  { %vm147_vm7 = vcmp.eq.s32.totalorder %v57_v24, %v146_v39 }
  0xe1   :  { %v150_v44 = vpop.permute.xlu1 %149 }
  0xe2   :  { %vm151_vm8 = vcmp.eq.s32.totalorder %v150_v44, 1 }
  0xe3   :  { %vm152_vm9 = vmand %vm147_vm7, %vm151_vm8 }
  0xe4   :  { %v368_v46 = vsel %vm152_vm9, 1.0, %v572_v4 }
  0xe5   :  { %v155_v47 = vadd.f32 %v368_v46, %v143_v45 }
  0xe7   :  { %v157_v48 = vsel %vm156_vm10, %v155_v47, 0.0  ;;  %v161_v49 = vpack.c.bf16 %v155_v47, %v155_v47 }
  0xe8   :  { %158 = vadd.xlane.f32.xlu0 %v157_v48 }
  0xe9   :  { %405 = vmatmul.mubr.msk.bf16.vlgmr.msra.gmra.mrb[0].mxu0 %vm156_vm10, %v161_v49 }
 0x175   :  { %v159_v58 = vpop.xlane.xlu0 %158 }
 0x176   :  { %v160_v59 = vmax.f32 %v159_v58, 1.0 }
 0x178   :  { %469 = vrcp.f32 %v160_v59 }
 0x182   :  { %v470_v60 = vpop.eup %469 }
 0x1bc   :  { %v231_v61 = vpop.f32.mrb[0].mxu0 }
 0x1bd   :  { %v238_v62 = vmul.f32 %v470_v60, %v231_v61  ;;  %v406_v63 = vpop.f32.mrb[1].mxu0 }
 0x1be   :  { %v234_v0 = vpop.f32.mrb[2].mxu0 }
 0x1bf   :  { %v239_v1 = vpack.c.bf16 %v238_v62, %v238_v62  ;;  %v407_v2 = vpop.f32.mrb[3].mxu0 }
 0x1c1   :  { %425 = vmatmul.mubr.bf16.vlgmr.msra.gmra.mrb[0].mxu1 %v239_v1 }
 0x294   :  { %v338_v3 = vpop.f32.mrb[0].mxu1 }
 0x295   :  { %344 = vst [vmem:[#allocation8] sm:$0xff] %v338_v3  ;;  %v426_v5 = vpop.f32.mrb[1].mxu1 }
 0x296   :  { %v341_v4 = vpop.f32.mrb[2].mxu1 }
 0x297   :  { %548 = shalt.err (!%p545_p0)
}
 0x298   :  { %s549_s25 = scalar_lea.hbm %s680_s3, 128 }
 0x299   :  { %p550_p1 = scmp.ne.s32.totalorder %s680_s3, %s549_s25  ;;  %p553_p2 = scmp.lt.u32.totalorder %s549_s25, %s680_s3 }
 0x29b   :  { %p555_p3 = pnand %p553_p2, %p550_p1 }
 0x29d   :  { %558 = shalt.err (!%p555_p3)
}
 0x29e   :  { %354 = dma.vmem_to_hbm [thread:$0]  %s352_s21, 128, %s680_s3, [#allocation4]   ;;  %v427_v6 = vpop.f32.mrb[3].mxu1 }
 0x29f   :  { %563 = dma.done.wait [#allocation4], 128  }
 0x2a0   :  { %564 = vsyncadd [#allocation4], 4294967168 }
 0x2a1   :  { %358 = vsyncpa [#allocation3], 1 }
 0x2a2   :  { %359 = vsyncpa [#allocation6], 1 }
 0x2a3   :  { %360 = vsyncpa [#allocation4], 1 }

</bundles_post_ra>
